<compile_context>
chip_gen: v5e
topology: v5e:2x2
jax: 0.10.0
libtpu: 0.0.40
codegen_flags: <defaults>
</compile_context>

<pallas_src>
import functools

import jax
import jax.numpy as jnp
from jax.experimental import pallas as pl
from jax.experimental.pallas import tpu as pltpu


def _round_up(v, m):
    return (v + m - 1) // m * m


def _tpu_generation():
    """Best-effort TPU generation detection: 'v5' / 'v6' / 'v7' / 'unknown'."""
    kind = ""
    try:
        kind = (jax.devices()[0].device_kind or "").lower()
    except Exception:
        pass
    for g in ("v7", "v6", "v5"):
        if g in kind:
            return g
    return "unknown"


def _vmem_cap_bytes(gen):
    """Physical VMEM per TensorCore, with a generation-based fallback."""
    try:
        return int(pltpu.get_tpu_info().vmem_capacity_bytes)
    except Exception:
        return (64 << 20) if gen == "v7" else (128 << 20)


def _critic_kernel(x_ref, w1_ref, b1_ref, w2_ref, b2_ref,
                   w3_ref, b3_ref, w4_ref, b4_ref, o_ref):
    wdt = w1_ref.dtype  # native MXU input dtype (f32 or bf16)

    # Layer 1: (nh_p, nx) @ (nx, tb) on the MXU in the weight dtype, f32 acc.
    # Input tile is cast to wdt so bf16 weights keep the bf16 MXU fast path.
    h = jnp.dot(w1_ref[...], x_ref[...].astype(wdt),
                preferred_element_type=jnp.float32)
    h = jnp.maximum(h + b1_ref[...].astype(jnp.float32), 0.0)

    # Layer 2.
    h = jnp.dot(w2_ref[...], h.astype(wdt), preferred_element_type=jnp.float32)
    h = jnp.maximum(h + b2_ref[...].astype(jnp.float32), 0.0)

    # Layer 3.
    h = jnp.dot(w3_ref[...], h.astype(wdt), preferred_element_type=jnp.float32)
    h = jnp.maximum(h + b3_ref[...].astype(jnp.float32), 0.0)

    # Layer 4 (out_features == 1): (1, nh_p) @ (nh_p, tb) -> lane-dense (1, tb)
    # directly on the MXU.  No in-kernel transpose, no masked (tb, 1) store.
    out = jnp.dot(w4_ref[...], h.astype(wdt), preferred_element_type=jnp.float32)
    o_ref[...] = (out + b4_ref[0]).astype(o_ref.dtype)


@functools.partial(jax.jit, static_argnames=("tb", "weight_dtype"))
def critic_forward(x, params, tb=None, weight_dtype=None):
    """Pallas implementation of Critic.forward: returns shape (B,)."""
    w1, b1, w2, b2, w3, b3, w4, b4 = params
    B, nx = x.shape
    nh = w1.shape[1]

    gen = _tpu_generation()
    vmem_cap = _vmem_cap_bytes(gen)

    # Hidden-width padding granularity: 256-aligned K/N feeds the 2x256x256
    # MXUs on v6e/v7x for awkward hidden sizes; 128 already fits v5e perfectly.
    gran = 256 if (gen in ("v6", "v7") and nh > 128) else 128
    nh_p = _round_up(nh, gran)
    dnh = nh_p - nh

    # ---- host-side prep: transposed layout, zero-padded hidden width -------
    # Zero padding is exact: padded pre-activations are 0, ReLU keeps them 0,
    # and padded weight rows/cols contribute nothing downstream.
    wdt = jnp.dtype(weight_dtype) if weight_dtype is not None else jnp.dtype(w1.dtype)
    w1t = jnp.pad(w1.T, ((0, dnh), (0, 0))).astype(wdt)            # (nh_p, nx)
    w2t = jnp.pad(w2.T, ((0, dnh), (0, dnh))).astype(wdt)          # (nh_p, nh_p)
    w3t = jnp.pad(w3.T, ((0, dnh), (0, dnh))).astype(wdt)          # (nh_p, nh_p)
    w4t = jnp.pad(w4.T, ((0, 0), (0, dnh))).astype(wdt)            # (1, nh_p)
    b1c = jnp.pad(b1, (0, dnh)).astype(jnp.float32).reshape(nh_p, 1)
    b2c = jnp.pad(b2, (0, dnh)).astype(jnp.float32).reshape(nh_p, 1)
    b3c = jnp.pad(b3, (0, dnh)).astype(jnp.float32).reshape(nh_p, 1)
    b4s = b4.astype(jnp.float32).reshape(1)                        # scalar via SMEM

    w_item = wdt.itemsize
    x_item = jnp.dtype(x.dtype).itemsize
    lane = lambda n: _round_up(max(n, 1), 128)
    sub = lambda n: _round_up(max(n, 1), 8)
    weight_bytes = (sub(nh_p) * lane(nx) + 2 * nh_p * nh_p + sub(1) * nh_p) * w_item
    bias_bytes = 3 * nh_p * 128 * 4

    # ---- batch tiling -------------------------------------------------------
    if tb is None:
        tb = 512 if gen == "v6" else 256   # fatter tiles amortize per-step overhead
    tb_base = max(128, _round_up(tb, 128))
    if B > tb_base:
        tb_eff = tb_base
    else:
        # Single tile covering the whole (8-aligned) batch on single-TC parts.
        tb_eff = _round_up(B, 8)
        if gen == "v7" and tb_eff >= 256:
            # v7x megacore: split only when per-core compute clearly exceeds one
            # weight load from HBM (each TC re-DMAs the resident weights), and
            # keep the lane width a multiple of 128.
            half = _round_up(tb_eff // 2, 128)
            flops_half = 2 * half * (nx * nh_p + 2 * nh_p * nh_p + nh_p)
            if flops_half > 300 * (weight_bytes + bias_bytes):
                tb_eff = half
    B_pad = _round_up(B, tb_eff)
    num_tiles = B_pad // tb_eff

    x_t = x.T                                                      # (nx, B)
    if B_pad != B:
        x_t = jnp.pad(x_t, ((0, 0), (0, B_pad - B)))

    # ---- VMEM budget (generation-aware) -------------------------------------
    io_bytes = 2 * (sub(nx) * lane(tb_eff) + 8 * lane(tb_eff)) * x_item
    act_bytes = 3 * nh_p * lane(tb_eff) * 4
    need = weight_bytes + bias_bytes + io_bytes + act_bytes + (4 << 20)
    cap = (40 << 20) if vmem_cap <= (64 << 20) else (96 << 20)
    vmem_limit = int(min(max(need, 32 << 20), cap))
    # TODO(synk): for very large nhidden (resident weights > cap on v7x), stream
    # w2/w3 over an extra "arbitrary" nh_p-tiling grid axis with an f32
    # accumulator instead of keeping them resident.

    # Resident weight/bias blocks: constant index map (loaded once, stays in
    # VMEM across grid steps) and single-buffered (no double-buffer waste).
    def resident(shape):
        return pl.BlockSpec(shape, lambda i: (0, 0), pipeline_mode=pl.Buffered(1))

    flops = 2 * B_pad * (nx * nh_p + 2 * nh_p * nh_p + nh_p)
    bytes_accessed = (weight_bytes + bias_bytes
                      + B_pad * nx * x_item + B_pad * x_item)

    out = pl.pallas_call(
        _critic_kernel,
        out_shape=jax.ShapeDtypeStruct((1, B_pad), x.dtype),
        grid_spec=pltpu.PrefetchScalarGridSpec(
            num_scalar_prefetch=0,
            grid=(num_tiles,),
            in_specs=[
                pl.BlockSpec((nx, tb_eff), lambda i: (0, i)),        # x^T batch tile
                resident((nh_p, nx)), resident((nh_p, 1)),           # layer 1
                resident((nh_p, nh_p)), resident((nh_p, 1)),         # layer 2
                resident((nh_p, nh_p)), resident((nh_p, 1)),         # layer 3
                resident((1, nh_p)),                                 # layer 4 row
                pl.BlockSpec(memory_space=pltpu.MemorySpace.SMEM),   # b4 scalar
            ],
            # Lane-dense output: batch maps to lanes, one (1, tb) row per step.
            out_specs=pl.BlockSpec((1, tb_eff), lambda i: (0, i)),
        ),
        compiler_params=pltpu.CompilerParams(
            dimension_semantics=("parallel",),
            vmem_limit_bytes=vmem_limit),
        cost_estimate=pl.CostEstimate(
            flops=int(flops), transcendentals=0,
            bytes_accessed=int(bytes_accessed)),
    )(x_t, w1t, b1c, w2t, b2c, w3t, b3c, w4t, b4s)

    return out[0, :B]   # .view(-1)


def init_critic_params(key, nhidden, nx, dtype=jnp.float32):
    """Deterministic init mimicking nn.Linear default (uniform +/- 1/sqrt(fan_in))."""
    dims = [(nx, nhidden), (nhidden, nhidden), (nhidden, nhidden), (nhidden, 1)]
    params = []
    for fan_in, fan_out in dims:
        key, kw, kb = jax.random.split(key, 3)
        bound = 1.0 / jnp.sqrt(fan_in)
        w = jax.random.uniform(kw, (fan_in, fan_out), dtype, -bound, bound)
        b = jax.random.uniform(kb, (fan_out,), dtype, -bound, bound)
        params += [w, b]
    return tuple(params)


def critic_ref(x, params):
    """Pure-JAX reference for correctness checking."""
    w1, b1, w2, b2, w3, b3, w4, b4 = params
    h = jnp.maximum(x @ w1 + b1, 0.0)
    h = jnp.maximum(h @ w2 + b2, 0.0)
    h = jnp.maximum(h @ w3 + b3, 0.0)
    return (h @ w4 + b4).reshape(-1)


if __name__ == "__main__":
    key = jax.random.PRNGKey(0)
    B, nx, nhidden = 8, 16, 32

    kx, kp = jax.random.split(key)
    x = jax.random.normal(kx, (B, nx), dtype=jnp.float32)
    params = init_critic_params(kp, nhidden, nx)

    ref = critic_ref(x, params)

    # f32 weights: exact path.
    out = jax.block_until_ready(critic_forward(x, params))
    assert out.shape == (B,), out.shape
    assert jnp.allclose(out, ref, atol=1e-4, rtol=1e-4), (out, ref)

    # bf16 weights: halves weight VMEM/HBM traffic, bf16 MXU rate; loose check.
    out_bf16 = jax.block_until_ready(
        critic_forward(x, params, weight_dtype=jnp.bfloat16))
    assert out_bf16.shape == (B,), out_bf16.shape
    assert bool(jnp.all(jnp.isfinite(out_bf16)))
    assert jnp.allclose(out_bf16, ref, atol=1e-1, rtol=1e-1), (out_bf16, ref)

    print("KERNEL_OK")
</pallas_src>

<mosaic_0001>
module attributes {stable_mosaic.version = 11 : i64} {
  func.func @_critic_kernel(%arg0: i32, %arg1: memref<16x8xf32, #tpu.memory_space<vmem>>, %arg2: memref<128x16xf32, #tpu.memory_space<vmem>>, %arg3: memref<128x1xf32, #tpu.memory_space<vmem>>, %arg4: memref<128x128xf32, #tpu.memory_space<vmem>>, %arg5: memref<128x1xf32, #tpu.memory_space<vmem>>, %arg6: memref<128x128xf32, #tpu.memory_space<vmem>>, %arg7: memref<128x1xf32, #tpu.memory_space<vmem>>, %arg8: memref<1x128xf32, #tpu.memory_space<vmem>>, %arg9: memref<1xf32, #tpu.memory_space<smem>>, %arg10: memref<1x8xf32, #tpu.memory_space<vmem>>) attributes {dimension_semantics = [#tpu.dimension_semantics<parallel>], iteration_bounds = array<i64: 1>, scalar_prefetch = 0 : i64, scratch_operands = 0 : i64, tpu.core_type = #tpu.core_type<tc>, window_params = [{transform_indices = @transform_0, window_bounds = array<i64: 16, 8>}, {pipeline_mode = #tpu.pipeline_mode<synchronous>, transform_indices = @transform_1, window_bounds = array<i64: 128, 16>}, {pipeline_mode = #tpu.pipeline_mode<synchronous>, transform_indices = @transform_2, window_bounds = array<i64: 128, 1>}, {pipeline_mode = #tpu.pipeline_mode<synchronous>, transform_indices = @transform_3, window_bounds = array<i64: 128, 128>}, {pipeline_mode = #tpu.pipeline_mode<synchronous>, transform_indices = @transform_4, window_bounds = array<i64: 128, 1>}, {pipeline_mode = #tpu.pipeline_mode<synchronous>, transform_indices = @transform_5, window_bounds = array<i64: 128, 128>}, {pipeline_mode = #tpu.pipeline_mode<synchronous>, transform_indices = @transform_6, window_bounds = array<i64: 128, 1>}, {pipeline_mode = #tpu.pipeline_mode<synchronous>, transform_indices = @transform_7, window_bounds = array<i64: 1, 128>}, {transform_indices = @transform_8, window_bounds = array<i64: 1>}, {transform_indices = @transform_9, window_bounds = array<i64: 1, 8>}]} {
    %c0 = arith.constant 0 : index
    %c0_0 = arith.constant 0 : index
    %0 = vector.load %arg2[%c0, %c0_0] : memref<128x16xf32, #tpu.memory_space<vmem>>, vector<128x16xf32>
    %c0_1 = arith.constant 0 : index
    %c0_2 = arith.constant 0 : index
    %1 = vector.load %arg1[%c0_1, %c0_2] : memref<16x8xf32, #tpu.memory_space<vmem>>, vector<16x8xf32>
    %cst = arith.constant dense<0.000000e+00> : vector<128x8xf32>
    %2 = tpu.matmul %0, %1, %cst {dimension_numbers = #tpu.dot_dimension_numbers<[1], [0], [0], [1], [0, 0, 1, 1], [], []>} : vector<128x16xf32>, vector<16x8xf32>, vector<128x8xf32> -> vector<128x8xf32>
    %c0_3 = arith.constant 0 : index
    %c0_4 = arith.constant 0 : index
    %3 = vector.load %arg3[%c0_3, %c0_4] : memref<128x1xf32, #tpu.memory_space<vmem>>, vector<128x1xf32>
    %4 = vector.broadcast %3 : vector<128x1xf32> to vector<128x8xf32>
    %5 = arith.addf %2, %4 : vector<128x8xf32>
    %cst_5 = arith.constant 0.000000e+00 : f32
    %6 = vector.broadcast %cst_5 : f32 to vector<128x8xf32>
    %7 = arith.maximumf %5, %6 : vector<128x8xf32>
    %c0_6 = arith.constant 0 : index
    %c0_7 = arith.constant 0 : index
    %8 = vector.load %arg4[%c0_6, %c0_7] : memref<128x128xf32, #tpu.memory_space<vmem>>, vector<128x128xf32>
    %cst_8 = arith.constant dense<0.000000e+00> : vector<128x8xf32>
    %9 = tpu.matmul %8, %7, %cst_8 {dimension_numbers = #tpu.dot_dimension_numbers<[1], [0], [0], [1], [0, 0, 1, 1], [], []>} : vector<128x128xf32>, vector<128x8xf32>, vector<128x8xf32> -> vector<128x8xf32>
    %c0_9 = arith.constant 0 : index
    %c0_10 = arith.constant 0 : index
    %10 = vector.load %arg5[%c0_9, %c0_10] : memref<128x1xf32, #tpu.memory_space<vmem>>, vector<128x1xf32>
    %11 = vector.broadcast %10 : vector<128x1xf32> to vector<128x8xf32>
    %12 = arith.addf %9, %11 : vector<128x8xf32>
    %cst_11 = arith.constant 0.000000e+00 : f32
    %13 = vector.broadcast %cst_11 : f32 to vector<128x8xf32>
    %14 = arith.maximumf %12, %13 : vector<128x8xf32>
    %c0_12 = arith.constant 0 : index
    %c0_13 = arith.constant 0 : index
    %15 = vector.load %arg6[%c0_12, %c0_13] : memref<128x128xf32, #tpu.memory_space<vmem>>, vector<128x128xf32>
    %cst_14 = arith.constant dense<0.000000e+00> : vector<128x8xf32>
    %16 = tpu.matmul %15, %14, %cst_14 {dimension_numbers = #tpu.dot_dimension_numbers<[1], [0], [0], [1], [0, 0, 1, 1], [], []>} : vector<128x128xf32>, vector<128x8xf32>, vector<128x8xf32> -> vector<128x8xf32>
    %c0_15 = arith.constant 0 : index
    %c0_16 = arith.constant 0 : index
    %17 = vector.load %arg7[%c0_15, %c0_16] : memref<128x1xf32, #tpu.memory_space<vmem>>, vector<128x1xf32>
    %18 = vector.broadcast %17 : vector<128x1xf32> to vector<128x8xf32>
    %19 = arith.addf %16, %18 : vector<128x8xf32>
    %cst_17 = arith.constant 0.000000e+00 : f32
    %20 = vector.broadcast %cst_17 : f32 to vector<128x8xf32>
    %21 = arith.maximumf %19, %20 : vector<128x8xf32>
    %c0_18 = arith.constant 0 : index
    %c0_19 = arith.constant 0 : index
    %22 = vector.load %arg8[%c0_18, %c0_19] : memref<1x128xf32, #tpu.memory_space<vmem>>, vector<1x128xf32>
    %cst_20 = arith.constant dense<0.000000e+00> : vector<1x8xf32>
    %23 = tpu.matmul %22, %21, %cst_20 {dimension_numbers = #tpu.dot_dimension_numbers<[1], [0], [0], [1], [0, 0, 1, 1], [], []>} : vector<1x128xf32>, vector<128x8xf32>, vector<1x8xf32> -> vector<1x8xf32>
    %c0_21 = arith.constant 0 : index
    %24 = memref.load %arg9[%c0_21] : memref<1xf32, #tpu.memory_space<smem>>
    %25 = vector.broadcast %24 : f32 to vector<1x8xf32>
    %26 = arith.addf %23, %25 : vector<1x8xf32>
    %c0_22 = arith.constant 0 : index
    %c0_23 = arith.constant 0 : index
    %27 = vector.load %arg10[%c0_22, %c0_23] : memref<1x8xf32, #tpu.memory_space<vmem>>, vector<1x8xf32>
    tpu.vector_store %arg10[%c0_22, %c0_23], %26 {strides = array<i32>} : memref<1x8xf32, #tpu.memory_space<vmem>>, vector<1x8xf32>,
    return
  }
  func.func @transform_0(%arg0: i32) -> (i32, i32) {
    %c0_i32 = arith.constant 0 : i32
    %c0_i32_0 = arith.constant 0 : i32
    return %c0_i32, %arg0 : i32, i32
  }
  func.func @transform_1(%arg0: i32) -> (i32, i32) {
    %c0_i32 = arith.constant 0 : i32
    %c0_i32_0 = arith.constant 0 : i32
    %c0_i32_1 = arith.constant 0 : i32
    return %c0_i32, %c0_i32_0 : i32, i32
  }
  func.func @transform_2(%arg0: i32) -> (i32, i32) {
    %c0_i32 = arith.constant 0 : i32
    %c0_i32_0 = arith.constant 0 : i32
    %c0_i32_1 = arith.constant 0 : i32
    return %c0_i32, %c0_i32_0 : i32, i32
  }
  func.func @transform_3(%arg0: i32) -> (i32, i32) {
    %c0_i32 = arith.constant 0 : i32
    %c0_i32_0 = arith.constant 0 : i32
    %c0_i32_1 = arith.constant 0 : i32
    return %c0_i32, %c0_i32_0 : i32, i32
  }
  func.func @transform_4(%arg0: i32) -> (i32, i32) {
    %c0_i32 = arith.constant 0 : i32
    %c0_i32_0 = arith.constant 0 : i32
    %c0_i32_1 = arith.constant 0 : i32
    return %c0_i32, %c0_i32_0 : i32, i32
  }
  func.func @transform_5(%arg0: i32) -> (i32, i32) {
    %c0_i32 = arith.constant 0 : i32
    %c0_i32_0 = arith.constant 0 : i32
    %c0_i32_1 = arith.constant 0 : i32
    return %c0_i32, %c0_i32_0 : i32, i32
  }
  func.func @transform_6(%arg0: i32) -> (i32, i32) {
    %c0_i32 = arith.constant 0 : i32
    %c0_i32_0 = arith.constant 0 : i32
    %c0_i32_1 = arith.constant 0 : i32
    return %c0_i32, %c0_i32_0 : i32, i32
  }
  func.func @transform_7(%arg0: i32) -> (i32, i32) {
    %c0_i32 = arith.constant 0 : i32
    %c0_i32_0 = arith.constant 0 : i32
    %c0_i32_1 = arith.constant 0 : i32
    return %c0_i32, %c0_i32_0 : i32, i32
  }
  func.func @transform_8(%arg0: i32) -> i32 {
    %c0_i32 = arith.constant 0 : i32
    %c0_i32_0 = arith.constant 0 : i32
    return %c0_i32 : i32
  }
  func.func @transform_9(%arg0: i32) -> (i32, i32) {
    %c0_i32 = arith.constant 0 : i32
    %c0_i32_0 = arith.constant 0 : i32
    return %c0_i32, %arg0 : i32, i32
  }
}

</mosaic_0001>

<bundles_post_ra>
// kernel: critic_forward.1
= control target key start
LH: loop header
LB: loop body
LE: loop exit
PB: predicated region body
PF: predicated region fallthrough
CT: control target
= control target key end

     0   :  { %v784_v3 = vmov 0   ;;  %vm148_vm0 = vcmask 130048   ;;  %s1182_s0 = inlined_call_operand.vmem [shape: f32[16,8], index: 0, kind: input, shape index: {}]   ;;  %s1183_s1 = inlined_call_operand.vmem [shape: f32[128,16], index: 1, kind: input, shape index: {}]   ;;  %s1184_s2 = inlined_call_operand.vmem [shape: f32[128,1], index: 2, kind: input, shape index: {}]   ;;  %s1185_s3 = inlined_call_operand.vmem [shape: f32[128,128], index: 3, kind: input, shape index: {}]   ;;  %s1186_s4 = inlined_call_operand.vmem [shape: f32[128,1], index: 4, kind: input, shape index: {}]   ;;  %s1187_s5 = inlined_call_operand.vmem [shape: f32[128,128], index: 5, kind: input, shape index: {}]   ;;  %s1188_s6 = inlined_call_operand.vmem [shape: f32[128,1], index: 6, kind: input, shape index: {}]   ;;  %s1189_s7 = inlined_call_operand.vmem [shape: f32[1,128], index: 7, kind: input, shape index: {}]   ;;  %s1190_s8 = inlined_call_operand.<no memory space> [shape: f32[1], index: 8, kind: input, shape index: {}]   ;;  %s1191_s9 = inlined_call_operand.hbm [shape: f32[1,8], index: 9, kind: output, shape index: {}]  }
   0x1   :  { %v51_v0 = vld [vmem:[%s1182_s0 + $0x8] sm:$0xff]  ;;  %v67_v1 = vld [vmem:[%s1184_s2 + $0x78] sm:$0xff]  ;;  %756 = vset.pattern.permute.xlu1 %v784_v3  ;;  %755 = vset.pattern.permute.xlu0 %v784_v3  ;;  %v50_v4 = vld [vmem:[%s1182_s0] sm:$0xff] }
   0x2   :  { %v65_v2 = vld [vmem:[%s1184_s2 + $0x68] sm:$0xff]  ;;  %211 = vmatpush.msra.mxu0 %v51_v0  ;;  %145 = vperm.xlu0 %755, %v67_v1   ;;  %v34_v5 = vld [vmem:[%s1183_s1] sm:$0xff]  ;;  %v63_v6 = vld [vmem:[%s1184_s2 + $0x58] sm:$0xff] }
   0x3   :  { %135 = vperm.xlu1 %756, %v65_v2   ;;  %757 = vset.pattern.permute.xlu2 %v784_v3  ;;  %v66_v7 = vld [vmem:[%s1184_s2 + $0x70] sm:$0xff] }
   0x4   :  { %212 = vmatpush.msra.mxu0 %v50_v4  ;;  %125 = vperm.xlu2 %757, %v63_v6  }
   0x5   :  { %705 = vmatmul.msk.f32.vlgmr.msra.gmra.mxu0 %vm148_vm0, %v34_v5 }
   0x6   :  { %15 = vsyncpa [#allocation4], 0  ;;  %v64_v8 = vld [vmem:[%s1184_s2 + $0x60] sm:$0xff]  ;;  %v62_v9 = vld [vmem:[%s1184_s2 + $0x50] sm:$0xff]  ;;  %s785_s14 = smov [#allocation3]   ;;  %s696_s17 = sshll.u32 %s1191_s9, 4  ;;  %s697_s17 = int_to_ptr.hbm [resolvable:$true] %s696_s17 }
   0x7   :  { %v35_v10 = vld [vmem:[%s1183_s1 + $0x8] sm:$0xff]  ;;  %v60_v12 = vld [vmem:[%s1184_s2 + $0x40] sm:$0xff]  ;;  %v59_v13 = vld [vmem:[%s1184_s2 + $0x38] sm:$0xff]  ;;  %vm687_vm1 = vcmask 57344  }
   0x8   :  { %v61_v11 = vld [vmem:[%s1184_s2 + $0x48] sm:$0xff]  ;;  %v36_v14 = vld [vmem:[%s1183_s1 + $0x10] sm:$0xff]  ;;  %v56_v17 = vld [vmem:[%s1184_s2 + $0x20] sm:$0xff] }
   0x9   :  { %v58_v15 = vld [vmem:[%s1184_s2 + $0x30] sm:$0xff]  ;;  %v57_v16 = vld [vmem:[%s1184_s2 + $0x28] sm:$0xff]  ;;  %v37_v18 = vld [vmem:[%s1183_s1 + $0x18] sm:$0xff] }
   0xa   :  { %140 = vperm.xlu0 %755, %v66_v7   ;;  %v55_v19 = vld [vmem:[%s1184_s2 + $0x18] sm:$0xff]  ;;  %v54_v20 = vld [vmem:[%s1184_s2 + $0x10] sm:$0xff]  ;;  %v53_v21 = vld [vmem:[%s1184_s2 + $0x8] sm:$0xff] }
   0xb   :  { %130 = vperm.xlu1 %756, %v64_v8   ;;  %v38_v22 = vld [vmem:[%s1183_s1 + $0x20] sm:$0xff]  ;;  %v309_v24 = vld [vmem:[%s1186_s4 + $0x78] sm:$0xff]  ;;  %v308_v25 = vld [vmem:[%s1186_s4 + $0x70] sm:$0xff] }
   0xc   :  { %120 = vperm.xlu2 %757, %v62_v9   ;;  %v52_v23 = vld [vmem:[%s1184_s2] sm:$0xff]  ;;  %v39_v26 = vld [vmem:[%s1183_s1 + $0x28] sm:$0xff]  ;;  %v305_v29 = vld [vmem:[%s1186_s4 + $0x58] sm:$0xff] }
   0xd   :  { %706 = vmatmul.msk.f32.gmra.mxu0 %vm148_vm0, %v35_v10  ;;  %v307_v27 = vld [vmem:[%s1186_s4 + $0x68] sm:$0xff]  ;;  %v306_v28 = vld [vmem:[%s1186_s4 + $0x60] sm:$0xff]  ;;  %v40_v30 = vld [vmem:[%s1183_s1 + $0x30] sm:$0xff] }
   0xe   :  { %v304_v31 = vld [vmem:[%s1186_s4 + $0x50] sm:$0xff]  ;;  %v303_v32 = vld [vmem:[%s1186_s4 + $0x48] sm:$0xff]  ;;  %v302_v33 = vld [vmem:[%s1186_s4 + $0x40] sm:$0xff] }
   0xf   :  { %v41_v34 = vld [vmem:[%s1183_s1 + $0x38] sm:$0xff]  ;;  %v300_v36 = vld [vmem:[%s1186_s4 + $0x30] sm:$0xff]  ;;  %v299_v37 = vld [vmem:[%s1186_s4 + $0x28] sm:$0xff] }
  0x10   :  { %v301_v35 = vld [vmem:[%s1186_s4 + $0x38] sm:$0xff]  ;;  %v42_v38 = vld [vmem:[%s1183_s1 + $0x40] sm:$0xff]  ;;  %v296_v41 = vld [vmem:[%s1186_s4 + $0x10] sm:$0xff] }
  0x11   :  { %v298_v39 = vld [vmem:[%s1186_s4 + $0x20] sm:$0xff]  ;;  %v297_v40 = vld [vmem:[%s1186_s4 + $0x18] sm:$0xff]  ;;  %v43_v42 = vld [vmem:[%s1183_s1 + $0x48] sm:$0xff] }
  0x12   :  { %115 = vperm.xlu0 %755, %v61_v11   ;;  %v295_v43 = vld [vmem:[%s1186_s4 + $0x8] sm:$0xff]  ;;  %v294_v44 = vld [vmem:[%s1186_s4] sm:$0xff]  ;;  %v502_v45 = vld [vmem:[%s1188_s6 + $0x78] sm:$0xff]  ;;  %s694_s4 = sshll.u32 %s785_s14, 4  ;;  %s695_s4 = int_to_ptr.vmem [resolvable:$true] %s694_s4 }
  0x13   :  { %110 = vperm.xlu1 %756, %v60_v12   ;;  %v44_v46 = vld [vmem:[%s1183_s1 + $0x50] sm:$0xff]  ;;  %v500_v48 = vld [vmem:[%s1188_s6 + $0x68] sm:$0xff]  ;;  %v499_v49 = vld [vmem:[%s1188_s6 + $0x60] sm:$0xff] }
  0x14   :  { %105 = vperm.xlu2 %757, %v59_v13   ;;  %v501_v47 = vld [vmem:[%s1188_s6 + $0x70] sm:$0xff]  ;;  %v45_v50 = vld [vmem:[%s1183_s1 + $0x58] sm:$0xff]  ;;  %v46_v53 = vld [vmem:[%s1183_s1 + $0x60] sm:$0xff] }
  0x15   :  { %707 = vmatmul.msk.f32.gmra.mxu0 %vm148_vm0, %v36_v14  ;;  %v498_v51 = vld [vmem:[%s1188_s6 + $0x58] sm:$0xff]  ;;  %v497_v52 = vld [vmem:[%s1188_s6 + $0x50] sm:$0xff]  ;;  %v496_v54 = vld [vmem:[%s1188_s6 + $0x48] sm:$0xff] }
  0x16   :  { %v495_v55 = vld [vmem:[%s1188_s6 + $0x40] sm:$0xff]  ;;  %v494_v56 = vld [vmem:[%s1188_s6 + $0x38] sm:$0xff]  ;;  %v47_v57 = vld [vmem:[%s1183_s1 + $0x68] sm:$0xff] }
  0x17   :  { %v493_v58 = vld [vmem:[%s1188_s6 + $0x30] sm:$0xff]  ;;  %v492_v59 = vld [vmem:[%s1188_s6 + $0x28] sm:$0xff]  ;;  %v491_v60 = vld [vmem:[%s1188_s6 + $0x20] sm:$0xff] }
  0x18   :  { %v48_v61 = vld [vmem:[%s1183_s1 + $0x70] sm:$0xff]  ;;  %v490_v62 = vld [vmem:[%s1188_s6 + $0x18] sm:$0xff]  ;;  %v488_v0 = vld [vmem:[%s1188_s6 + $0x8] sm:$0xff] }
  0x19   :  { %v489_v63 = vld [vmem:[%s1188_s6 + $0x10] sm:$0xff]  ;;  %v49_v1 = vld [vmem:[%s1183_s1 + $0x78] sm:$0xff]  ;;  %v487_v2 = vld [vmem:[%s1188_s6] sm:$0xff] }
  0x1a   :  { %100 = vperm.xlu0 %755, %v58_v15  }
  0x1b   :  { %95 = vperm.xlu1 %756, %v57_v16  }
  0x1c   :  { %90 = vperm.xlu2 %757, %v56_v17  }
  0x1d   :  { %708 = vmatmul.msk.f32.gmra.mxu0 %vm148_vm0, %v37_v18 }
  0x22   :  { %85 = vperm.xlu0 %755, %v55_v19  }
  0x23   :  { %80 = vperm.xlu1 %756, %v54_v20  }
  0x24   :  { %75 = vperm.xlu2 %757, %v53_v21  }
  0x25   :  { %709 = vmatmul.msk.f32.gmra.mxu0 %vm148_vm0, %v38_v22 }
  0x2a   :  { %70 = vperm.xlu0 %755, %v52_v23  }
  0x2b   :  { %387 = vperm.xlu1 %756, %v309_v24  }
  0x2c   :  { %382 = vperm.xlu2 %757, %v308_v25  }
  0x2d   :  { %710 = vmatmul.msk.f32.gmra.mxu0 %vm148_vm0, %v39_v26 }
  0x32   :  { %377 = vperm.xlu0 %755, %v307_v27  }
  0x33   :  { %372 = vperm.xlu1 %756, %v306_v28  }
  0x34   :  { %367 = vperm.xlu2 %757, %v305_v29  }
  0x35   :  { %711 = vmatmul.msk.f32.gmra.mxu0 %vm148_vm0, %v40_v30 }
  0x3a   :  { %362 = vperm.xlu0 %755, %v304_v31  }
  0x3b   :  { %357 = vperm.xlu1 %756, %v303_v32  }
  0x3c   :  { %352 = vperm.xlu2 %757, %v302_v33  }
  0x3d   :  { %712 = vmatmul.msk.f32.gmra.mxu0 %vm148_vm0, %v41_v34 }
  0x42   :  { %347 = vperm.xlu0 %755, %v301_v35  }
  0x43   :  { %342 = vperm.xlu1 %756, %v300_v36  }
  0x44   :  { %337 = vperm.xlu2 %757, %v299_v37  }
  0x45   :  { %713 = vmatmul.msk.f32.gmra.mxu0 %vm148_vm0, %v42_v38 }
  0x4a   :  { %332 = vperm.xlu0 %755, %v298_v39  }
  0x4b   :  { %327 = vperm.xlu1 %756, %v297_v40  }
  0x4c   :  { %322 = vperm.xlu2 %757, %v296_v41  }
  0x4d   :  { %714 = vmatmul.msk.f32.gmra.mxu0 %vm148_vm0, %v43_v42 }
  0x52   :  { %317 = vperm.xlu0 %755, %v295_v43  }
  0x53   :  { %312 = vperm.xlu1 %756, %v294_v44  }
  0x54   :  { %580 = vperm.xlu2 %757, %v502_v45  }
  0x55   :  { %715 = vmatmul.msk.f32.gmra.mxu0 %vm148_vm0, %v44_v46 }
  0x5a   :  { %575 = vperm.xlu0 %755, %v501_v47  }
  0x5b   :  { %570 = vperm.xlu1 %756, %v500_v48  }
  0x5c   :  { %565 = vperm.xlu2 %757, %v499_v49  }
  0x5d   :  { %716 = vmatmul.msk.f32.gmra.mxu0 %vm148_vm0, %v45_v50 }
  0x5e   :  { %v126_v18 = vpop.permute.xlu2 %125 }
  0x62   :  { %560 = vperm.xlu0 %755, %v498_v51  }
  0x63   :  { %555 = vperm.xlu1 %756, %v497_v52  }
  0x64   :  { %550 = vperm.xlu2 %757, %v496_v54  }
  0x65   :  { %717 = vmatmul.msk.f32.gmra.mxu0 %vm148_vm0, %v46_v53 }
  0x66   :  { %v121_v23 = vpop.permute.xlu2 %120 }
  0x6a   :  { %545 = vperm.xlu0 %755, %v495_v55  }
  0x6b   :  { %540 = vperm.xlu1 %756, %v494_v56  }
  0x6c   :  { %535 = vperm.xlu2 %757, %v493_v58  }
  0x6d   :  { %718 = vmatmul.msk.f32.gmra.mxu0 %vm148_vm0, %v47_v57 }
  0x6e   :  { %v106_v31 = vpop.permute.xlu2 %105 }
  0x72   :  { %530 = vperm.xlu0 %755, %v492_v59  }
  0x73   :  { %525 = vperm.xlu1 %756, %v491_v60  }
  0x74   :  { %520 = vperm.xlu2 %757, %v490_v62   ;;  %v146_v15 = vpop.permute.xlu0 %145 }
  0x75   :  { %719 = vmatmul.msk.f32.gmra.mxu0 %vm148_vm0, %v48_v61  ;;  %v136_v17 = vpop.permute.xlu1 %135 }
  0x76   :  { %v91_v44 = vpop.permute.xlu2 %90 }
  0x7a   :  { %515 = vperm.xlu0 %755, %v489_v63  }
  0x7b   :  { %510 = vperm.xlu1 %756, %v488_v0  }
  0x7c   :  { %505 = vperm.xlu2 %757, %v487_v2   ;;  %v141_v20 = vpop.permute.xlu0 %140 }
  0x7d   :  { %720 = vmatmul.msk.f32.gmra.mxu0 %vm148_vm0, %v49_v1  ;;  %v131_v21 = vpop.permute.xlu1 %130 }
  0x7e   :  { %v76_v57 = vpop.permute.xlu2 %75 }
  0x82   :  { %v1050_v3 = vpop.f32.mrf.mxu0 }
  0x84   :  { %v116_v24 = vpop.permute.xlu0 %115 }
  0x85   :  { %v111_v28 = vpop.permute.xlu1 %110 }
  0x8a   :  { %v1052_v4 = vpop.f32.mrf.mxu0 }
  0x8b   :  { %v218_v61 = vadd.f32 %v1052_v4, %v76_v57  ;;  %v290_v4 = vld [vmem:[%s1185_s3 + $0x60] sm:$0xff] }
  0x8c   :  { %v101_v34 = vpop.permute.xlu0 %100 }
  0x8d   :  { %v96_v41 = vpop.permute.xlu1 %95  ;;  %v263_v1 = vmax.f32 %v218_v61, 0.0 }
  0x92   :  { %v1054_v5 = vpop.f32.mrf.mxu0 }
  0x94   :  { %v86_v47 = vpop.permute.xlu0 %85 }
  0x95   :  { %v81_v54 = vpop.permute.xlu1 %80 }
  0x96   :  { %v221_v58 = vadd.f32 %v1054_v5, %v81_v54  ;;  %v278_v5 = vld [vmem:[%s1185_s3] sm:$0xff] }
  0x98   :  { %v264_v63 = vmax.f32 %v221_v58, 0.0 }
  0x9a   :  { %v1056_v6 = vpop.f32.mrf.mxu0 }
  0x9b   :  { %v224_v55 = vadd.f32 %v1056_v6, %v86_v47  ;;  %v291_v6 = vld [vmem:[%s1185_s3 + $0x68] sm:$0xff] }
  0x9c   :  { %v71_v60 = vpop.permute.xlu0 %70 }
  0x9d   :  { %v265_v62 = vmax.f32 %v224_v55, 0.0  ;;  %v215_v0 = vadd.f32 %v1050_v3, %v71_v60  ;;  %v279_v3 = vld [vmem:[%s1185_s3 + $0x8] sm:$0xff] }
  0x9f   :  { %v262_v2 = vmax.f32 %v215_v0, 0.0 }
  0xa2   :  { %v226_v7 = vpop.f32.mrf.mxu0 }
  0xa3   :  { %v227_v52 = vadd.f32 %v226_v7, %v91_v44  ;;  %v280_v7 = vld [vmem:[%s1185_s3 + $0x10] sm:$0xff] }
  0xa5   :  { %v266_v59 = vmax.f32 %v227_v52, 0.0 }
  0xaa   :  { %v229_v8 = vpop.f32.mrf.mxu0 }
  0xab   :  { %v230_v50 = vadd.f32 %v229_v8, %v96_v41  ;;  %v292_v8 = vld [vmem:[%s1185_s3 + $0x70] sm:$0xff] }
  0xad   :  { %v267_v56 = vmax.f32 %v230_v50, 0.0 }
  0xb2   :  { %v232_v9 = vpop.f32.mrf.mxu0 }
  0xb3   :  { %v233_v48 = vadd.f32 %v232_v9, %v101_v34  ;;  %v281_v9 = vld [vmem:[%s1185_s3 + $0x18] sm:$0xff] }
  0xb5   :  { %v268_v53 = vmax.f32 %v233_v48, 0.0 }
  0xba   :  { %v235_v10 = vpop.f32.mrf.mxu0 }
  0xbb   :  { %v236_v45 = vadd.f32 %v235_v10, %v106_v31  ;;  %v293_v10 = vld [vmem:[%s1185_s3 + $0x78] sm:$0xff]  ;;  %v378_v31 = vpop.permute.xlu0 %377 }
  0xbd   :  { %v269_v51 = vmax.f32 %v236_v45, 0.0 }
  0xc2   :  { %v238_v11 = vpop.f32.mrf.mxu0 }
  0xc3   :  { %v239_v42 = vadd.f32 %v238_v11, %v111_v28  ;;  %v282_v11 = vld [vmem:[%s1185_s3 + $0x20] sm:$0xff] }
  0xc5   :  { %v270_v49 = vmax.f32 %v239_v42, 0.0 }
  0xca   :  { %v241_v12 = vpop.f32.mrf.mxu0 }
  0xcb   :  { %v242_v39 = vadd.f32 %v241_v12, %v116_v24  ;;  %v283_v12 = vld [vmem:[%s1185_s3 + $0x28] sm:$0xff] }
  0xcd   :  { %v271_v46 = vmax.f32 %v242_v39, 0.0 }
  0xd2   :  { %v244_v13 = vpop.f32.mrf.mxu0 }
  0xd3   :  { %v245_v37 = vadd.f32 %v244_v13, %v121_v23  ;;  %v284_v13 = vld [vmem:[%s1185_s3 + $0x30] sm:$0xff] }
  0xd5   :  { %v272_v43 = vmax.f32 %v245_v37, 0.0 }
  0xda   :  { %v247_v14 = vpop.f32.mrf.mxu0 }
  0xdb   :  { %v248_v35 = vadd.f32 %v247_v14, %v126_v18  ;;  %v285_v14 = vld [vmem:[%s1185_s3 + $0x38] sm:$0xff] }
  0xdc   :  { %v289_v18 = vld [vmem:[%s1185_s3 + $0x58] sm:$0xff] }
  0xdd   :  { %v273_v40 = vmax.f32 %v248_v35, 0.0 }
  0xe2   :  { %v250_v16 = vpop.f32.mrf.mxu0 }
  0xe3   :  { %v251_v32 = vadd.f32 %v250_v16, %v131_v21  ;;  %v287_v16 = vld [vmem:[%s1185_s3 + $0x48] sm:$0xff] }
  0xe5   :  { %v274_v38 = vmax.f32 %v251_v32, 0.0 }
  0xea   :  { %v253_v19 = vpop.f32.mrf.mxu0 }
  0xeb   :  { %v254_v29 = vadd.f32 %v253_v19, %v136_v17  ;;  %v288_v17 = vld [vmem:[%s1185_s3 + $0x50] sm:$0xff] }
  0xed   :  { %v275_v36 = vmax.f32 %v254_v29, 0.0 }
  0xf2   :  { %v256_v22 = vpop.f32.mrf.mxu0 }
  0xf3   :  { %v257_v26 = vadd.f32 %v256_v22, %v141_v20 }
  0xf5   :  { %v276_v33 = vmax.f32 %v257_v26, 0.0 }
  0xfa   :  { %v259_v25 = vpop.f32.mrf.mxu0 }
  0xfb   :  { %v260_v27 = vadd.f32 %v259_v25, %v146_v15  ;;  %v286_v15 = vld [vmem:[%s1185_s3 + $0x40] sm:$0xff]  ;;  %v388_v25 = vpop.permute.xlu1 %387 }
  0xfd   :  { %v277_v30 = vmax.f32 %v260_v27, 0.0  ;;  %v383_v27 = vpop.permute.xlu2 %382 }
  0xff   :  { %390 = vmatpush.msra.mxu1 %v277_v30  ;;  %721 = vmatpush.msra.mxu3 %v277_v30 }
 0x101   :  { %391 = vmatpush.msra.mxu1 %v276_v33  ;;  %722 = vmatpush.msra.mxu3 %v276_v33 }
 0x103   :  { %392 = vmatpush.msra.mxu1 %v275_v36  ;;  %723 = vmatpush.msra.mxu3 %v275_v36  ;;  %v373_v35 = vpop.permute.xlu1 %372 }
 0x105   :  { %393 = vmatpush.msra.mxu1 %v274_v38  ;;  %724 = vmatpush.msra.mxu3 %v274_v38  ;;  %v368_v45 = vpop.permute.xlu2 %367 }
 0x107   :  { %394 = vmatpush.msra.mxu1 %v273_v40  ;;  %725 = vmatpush.msra.mxu3 %v273_v40 }
 0x109   :  { %395 = vmatpush.msra.mxu1 %v272_v43  ;;  %726 = vmatpush.msra.mxu3 %v272_v43 }
 0x10b   :  { %396 = vmatpush.msra.mxu1 %v271_v46  ;;  %727 = vmatpush.msra.mxu3 %v271_v46  ;;  %v363_v46 = vpop.permute.xlu0 %362  ;;  %v358_v47 = vpop.permute.xlu1 %357 }
 0x10d   :  { %397 = vmatpush.msra.mxu1 %v270_v49  ;;  %728 = vmatpush.msra.mxu3 %v270_v49  ;;  %v353_v49 = vpop.permute.xlu2 %352 }
 0x10f   :  { %398 = vmatpush.msra.mxu1 %v269_v51  ;;  %729 = vmatpush.msra.mxu3 %v269_v51 }
 0x111   :  { %399 = vmatpush.msra.mxu1 %v268_v53  ;;  %730 = vmatpush.msra.mxu3 %v268_v53 }
 0x113   :  { %400 = vmatpush.msra.mxu1 %v267_v56  ;;  %731 = vmatpush.msra.mxu3 %v267_v56  ;;  %v348_v50 = vpop.permute.xlu0 %347  ;;  %v343_v51 = vpop.permute.xlu1 %342 }
 0x115   :  { %401 = vmatpush.msra.mxu1 %v266_v59  ;;  %732 = vmatpush.msra.mxu3 %v266_v59  ;;  %v338_v59 = vpop.permute.xlu2 %337 }
 0x117   :  { %402 = vmatpush.msra.mxu1 %v265_v62  ;;  %733 = vmatpush.msra.mxu3 %v265_v62 }
 0x119   :  { %403 = vmatpush.msra.mxu1 %v264_v63  ;;  %734 = vmatpush.msra.mxu3 %v264_v63 }
 0x11b   :  { %404 = vmatpush.msra.mxu1 %v263_v1  ;;  %735 = vmatpush.msra.mxu3 %v263_v1  ;;  %v333_v62 = vpop.permute.xlu0 %332  ;;  %v328_v1 = vpop.permute.xlu1 %327 }
 0x11d   :  { %405 = vmatpush.msra.mxu1 %v262_v2  ;;  %736 = vmatpush.msra.mxu3 %v262_v2 }
 0x11e   :  { %406 = vmatmul.f32.vlgmr.msra.gmra.mxu1 %v278_v5  ;;  %442 = vmatmul.f32.vlgmr.msra.gmra.mxu3 %v290_v4 }
 0x126   :  { %409 = vmatmul.f32.gmra.mxu1 %v279_v3  ;;  %445 = vmatmul.f32.gmra.mxu3 %v291_v6 }
 0x12e   :  { %412 = vmatmul.f32.gmra.mxu1 %v280_v7  ;;  %448 = vmatmul.f32.gmra.mxu3 %v292_v8  ;;  %v323_v8 = vpop.permute.xlu2 %322 }
 0x136   :  { %415 = vmatmul.f32.gmra.mxu1 %v281_v9  ;;  %451 = vmatmul.f32.gmra.mxu3 %v293_v10 }
 0x13e   :  { %418 = vmatmul.f32.gmra.mxu1 %v282_v11  ;;  %v318_v11 = vpop.permute.xlu0 %317 }
 0x146   :  { %421 = vmatmul.f32.gmra.mxu1 %v283_v12 }
 0x14e   :  { %424 = vmatmul.f32.gmra.mxu1 %v284_v13 }
 0x156   :  { %427 = vmatmul.f32.gmra.mxu1 %v285_v14  ;;  %v313_v14 = vpop.permute.xlu1 %312 }
 0x15e   :  { %430 = vmatmul.f32.gmra.mxu1 %v286_v15 }
 0x166   :  { %433 = vmatmul.f32.gmra.mxu1 %v287_v16 }
 0x16e   :  { %436 = vmatmul.f32.gmra.mxu1 %v288_v17 }
 0x176   :  { %439 = vmatmul.f32.gmra.mxu1 %v289_v18 }
 0x19b   :  { %v1110_v19 = vpop.f32.mrf.mxu1 }
 0x19c   :  { %v408_v15 = vadd.f32 %v1110_v19, %v313_v14  ;;  %v472_v19 = vld [vmem:[%s1187_s5 + $0x8] sm:$0xff] }
 0x19e   :  { %v455_v18 = vmax.f32 %v408_v15, 0.0 }
 0x1a1   :  { %v443_v20 = vpop.f32.mrf.mxu3 }
 0x1a2   :  { %v444_v36 = vadd.f32 %v443_v20, %v373_v35  ;;  %v471_v20 = vld [vmem:[%s1187_s5] sm:$0xff] }
 0x1a3   :  { %v1112_v21 = vpop.f32.mrf.mxu1 }
 0x1a4   :  { %v467_v39 = vmax.f32 %v444_v36, 0.0  ;;  %v411_v12 = vadd.f32 %v1112_v21, %v318_v11  ;;  %v483_v21 = vld [vmem:[%s1187_s5 + $0x60] sm:$0xff] }
 0x1a6   :  { %v456_v17 = vmax.f32 %v411_v12, 0.0 }
 0x1a9   :  { %v446_v22 = vpop.f32.mrf.mxu3 }
 0x1aa   :  { %v447_v33 = vadd.f32 %v446_v22, %v378_v31  ;;  %v484_v22 = vld [vmem:[%s1187_s5 + $0x68] sm:$0xff]  ;;  %v479_v31 = vld [vmem:[%s1187_s5 + $0x40] sm:$0xff] }
 0x1ab   :  { %v1114_v23 = vpop.f32.mrf.mxu1 }
 0x1ac   :  { %v468_v38 = vmax.f32 %v447_v33, 0.0  ;;  %v414_v9 = vadd.f32 %v1114_v23, %v323_v8  ;;  %v473_v23 = vld [vmem:[%s1187_s5 + $0x10] sm:$0xff] }
 0x1ad   :  { %v481_v33 = vld [vmem:[%s1187_s5 + $0x50] sm:$0xff] }
 0x1ae   :  { %v457_v16 = vmax.f32 %v414_v9, 0.0 }
 0x1b1   :  { %v449_v24 = vpop.f32.mrf.mxu3 }
 0x1b2   :  { %v450_v29 = vadd.f32 %v449_v24, %v383_v27  ;;  %v485_v24 = vld [vmem:[%s1187_s5 + $0x70] sm:$0xff]  ;;  %v475_v27 = vld [vmem:[%s1187_s5 + $0x20] sm:$0xff] }
 0x1b3   :  { %v416_v26 = vpop.f32.mrf.mxu1 }
 0x1b4   :  { %v469_v37 = vmax.f32 %v450_v29, 0.0  ;;  %v417_v6 = vadd.f32 %v416_v26, %v328_v1  ;;  %v486_v26 = vld [vmem:[%s1187_s5 + $0x78] sm:$0xff]  ;;  %v477_v29 = vld [vmem:[%s1187_s5 + $0x30] sm:$0xff] }
 0x1b6   :  { %v458_v13 = vmax.f32 %v417_v6, 0.0 }
 0x1b9   :  { %v452_v28 = vpop.f32.mrf.mxu3 }
 0x1ba   :  { %v453_v30 = vadd.f32 %v452_v28, %v388_v25  ;;  %v474_v25 = vld [vmem:[%s1187_s5 + $0x18] sm:$0xff]  ;;  %v476_v28 = vld [vmem:[%s1187_s5 + $0x28] sm:$0xff] }
 0x1bb   :  { %v419_v32 = vpop.f32.mrf.mxu1 }
 0x1bc   :  { %v470_v34 = vmax.f32 %v453_v30, 0.0  ;;  %v420_v4 = vadd.f32 %v419_v32, %v333_v62  ;;  %v478_v30 = vld [vmem:[%s1187_s5 + $0x38] sm:$0xff]  ;;  %v480_v32 = vld [vmem:[%s1187_s5 + $0x48] sm:$0xff] }
 0x1be   :  { %583 = vmatpush.msra.mxu2 %v470_v34  ;;  %737 = vmatpush.msrb.mxu3 %v470_v34  ;;  %v459_v10 = vmax.f32 %v420_v4, 0.0  ;;  %v482_v34 = vld [vmem:[%s1187_s5 + $0x58] sm:$0xff] }
 0x1c0   :  { %584 = vmatpush.msra.mxu2 %v469_v37  ;;  %738 = vmatpush.msrb.mxu3 %v469_v37 }
 0x1c2   :  { %585 = vmatpush.msra.mxu2 %v468_v38  ;;  %739 = vmatpush.msrb.mxu3 %v468_v38 }
 0x1c3   :  { %v422_v40 = vpop.f32.mrf.mxu1 }
 0x1c4   :  { %586 = vmatpush.msra.mxu2 %v467_v39  ;;  %740 = vmatpush.msrb.mxu3 %v467_v39  ;;  %v423_v2 = vadd.f32 %v422_v40, %v338_v59 }
 0x1c6   :  { %v460_v7 = vmax.f32 %v423_v2, 0.0 }
 0x1cb   :  { %v425_v41 = vpop.f32.mrf.mxu1 }
 0x1cc   :  { %v426_v63 = vadd.f32 %v425_v41, %v343_v51  ;;  %v581_v41 = vpop.permute.xlu2 %580 }
 0x1ce   :  { %v461_v3 = vmax.f32 %v426_v63, 0.0 }
 0x1d3   :  { %v428_v42 = vpop.f32.mrf.mxu1 }
 0x1d4   :  { %v429_v60 = vadd.f32 %v428_v42, %v348_v50  ;;  %v576_v42 = vpop.permute.xlu0 %575  ;;  %v566_v50 = vpop.permute.xlu2 %565 }
 0x1d6   :  { %v462_v5 = vmax.f32 %v429_v60, 0.0 }
 0x1db   :  { %v431_v43 = vpop.f32.mrf.mxu1 }
 0x1dc   :  { %v432_v57 = vadd.f32 %v431_v43, %v353_v49  ;;  %v551_v63 = vpop.permute.xlu2 %550 }
 0x1de   :  { %v463_v0 = vmax.f32 %v432_v57, 0.0 }
 0x1e3   :  { %v434_v44 = vpop.f32.mrf.mxu1 }
 0x1e4   :  { %v435_v55 = vadd.f32 %v434_v44, %v358_v47  ;;  %v571_v47 = vpop.permute.xlu1 %570 }
 0x1e6   :  { %v464_v61 = vmax.f32 %v435_v55, 0.0 }
 0x1eb   :  { %v437_v48 = vpop.f32.mrf.mxu1 }
 0x1ec   :  { %v438_v53 = vadd.f32 %v437_v48, %v363_v46  ;;  %v556_v62 = vpop.permute.xlu1 %555 }
 0x1ee   :  { %v465_v58 = vmax.f32 %v438_v53, 0.0 }
 0x1f3   :  { %v440_v52 = vpop.f32.mrf.mxu1 }
 0x1f4   :  { %v441_v54 = vadd.f32 %v440_v52, %v368_v45  ;;  %v541_v2 = vpop.permute.xlu1 %540 }
 0x1f6   :  { %v466_v56 = vmax.f32 %v441_v54, 0.0 }
 0x1f8   :  { %587 = vmatpush.msra.mxu2 %v466_v56  ;;  %741 = vmatpush.msrb.mxu3 %v466_v56 }
 0x1fa   :  { %588 = vmatpush.msra.mxu2 %v465_v58  ;;  %742 = vmatpush.msrb.mxu3 %v465_v58 }
 0x1fc   :  { %589 = vmatpush.msra.mxu2 %v464_v61  ;;  %743 = vmatpush.msrb.mxu3 %v464_v61  ;;  %v561_v61 = vpop.permute.xlu0 %560  ;;  %v526_v14 = vpop.permute.xlu1 %525 }
 0x1fe   :  { %590 = vmatpush.msra.mxu2 %v463_v0  ;;  %744 = vmatpush.msrb.mxu3 %v463_v0 }
 0x200   :  { %591 = vmatpush.msra.mxu2 %v462_v5  ;;  %745 = vmatpush.msrb.mxu3 %v462_v5  ;;  %v536_v5 = vpop.permute.xlu2 %535 }
 0x202   :  { %592 = vmatpush.msra.mxu2 %v461_v3  ;;  %746 = vmatpush.msrb.mxu3 %v461_v3 }
 0x204   :  { %593 = vmatpush.msra.mxu2 %v460_v7  ;;  %747 = vmatpush.msrb.mxu3 %v460_v7  ;;  %v546_v1 = vpop.permute.xlu0 %545 }
 0x206   :  { %594 = vmatpush.msra.mxu2 %v459_v10  ;;  %748 = vmatpush.msrb.mxu3 %v459_v10 }
 0x208   :  { %595 = vmatpush.msra.mxu2 %v458_v13  ;;  %749 = vmatpush.msrb.mxu3 %v458_v13 }
 0x20a   :  { %596 = vmatpush.msra.mxu2 %v457_v16  ;;  %750 = vmatpush.msrb.mxu3 %v457_v16 }
 0x20c   :  { %597 = vmatpush.msra.mxu2 %v456_v17  ;;  %751 = vmatpush.msrb.mxu3 %v456_v17  ;;  %v531_v11 = vpop.permute.xlu0 %530  ;;  %v521_v17 = vpop.permute.xlu2 %520 }
 0x20e   :  { %598 = vmatpush.msra.mxu2 %v455_v18  ;;  %752 = vmatpush.msrb.mxu3 %v455_v18 }
 0x20f   :  { %599 = vmatmul.f32.vlgmr.msra.gmra.mxu2 %v471_v20  ;;  %635 = vmatmul.f32.vlgmr.msrb.gmra.mxu3 %v483_v21 }
 0x217   :  { %602 = vmatmul.f32.gmra.mxu2 %v472_v19  ;;  %638 = vmatmul.f32.gmra.mxu3 %v484_v22 }
 0x21f   :  { %605 = vmatmul.f32.gmra.mxu2 %v473_v23  ;;  %641 = vmatmul.f32.gmra.mxu3 %v485_v24  ;;  %v516_v24 = vpop.permute.xlu0 %515 }
 0x227   :  { %608 = vmatmul.f32.gmra.mxu2 %v474_v25  ;;  %644 = vmatmul.f32.gmra.mxu3 %v486_v26 }
 0x22f   :  { %611 = vmatmul.f32.gmra.mxu2 %v475_v27  ;;  %v511_v27 = vpop.permute.xlu1 %510 }
 0x237   :  { %614 = vmatmul.f32.gmra.mxu2 %v476_v28 }
 0x23f   :  { %617 = vmatmul.f32.gmra.mxu2 %v477_v29 }
 0x247   :  { %620 = vmatmul.f32.gmra.mxu2 %v478_v30  ;;  %v506_v30 = vpop.permute.xlu2 %505 }
 0x24f   :  { %623 = vmatmul.f32.gmra.mxu2 %v479_v31 }
 0x257   :  { %626 = vmatmul.f32.gmra.mxu2 %v480_v32 }
 0x25f   :  { %629 = vmatmul.f32.gmra.mxu2 %v481_v33 }
 0x267   :  { %632 = vmatmul.f32.gmra.mxu2 %v482_v34 }
 0x292   :  { %v1167_v35 = vpop.f32.mrf.mxu2  ;;  %v636_v36 = vpop.f32.mrf.mxu3 }
 0x293   :  { %v637_v51 = vadd.f32 %v636_v36, %v566_v50  ;;  %v601_v31 = vadd.f32 %v1167_v35, %v506_v30  ;;  %v664_v36 = vld [vmem:[%s1189_s7] sm:$0x1] }
 0x295   :  { %v660_v55 = vmax.f32 %v637_v51, 0.0  ;;  %v648_v34 = vmax.f32 %v601_v31, 0.0 }
 0x29a   :  { %v1169_v37 = vpop.f32.mrf.mxu2  ;;  %v639_v38 = vpop.f32.mrf.mxu3 }
 0x29b   :  { %v640_v48 = vadd.f32 %v639_v38, %v571_v47  ;;  %v604_v28 = vadd.f32 %v1169_v37, %v511_v27  ;;  %v666_v37 = vstv %s1190_s8 }
 0x29d   :  { %v661_v53 = vmax.f32 %v640_v48, 0.0  ;;  %v649_v33 = vmax.f32 %v604_v28, 0.0 }
 0x2a2   :  { %v606_v39 = vpop.f32.mrf.mxu2  ;;  %v642_v40 = vpop.f32.mrf.mxu3 }
 0x2a3   :  { %v643_v45 = vadd.f32 %v642_v40, %v576_v42  ;;  %v607_v25 = vadd.f32 %v606_v39, %v516_v24 }
 0x2a5   :  { %v662_v52 = vmax.f32 %v643_v45, 0.0  ;;  %v650_v32 = vmax.f32 %v607_v25, 0.0 }
 0x2aa   :  { %v609_v43 = vpop.f32.mrf.mxu2  ;;  %v645_v44 = vpop.f32.mrf.mxu3 }
 0x2ab   :  { %v646_v46 = vadd.f32 %v645_v44, %v581_v41  ;;  %v610_v22 = vadd.f32 %v609_v43, %v521_v17 }
 0x2ad   :  { %v663_v49 = vmax.f32 %v646_v46, 0.0  ;;  %v651_v29 = vmax.f32 %v610_v22, 0.0 }
 0x2af   :  { %667 = vmatpush.msra.mxu3 %v663_v49 }
 0x2b1   :  { %668 = vmatpush.msra.mxu3 %v662_v52 }
 0x2b2   :  { %v612_v54 = vpop.f32.mrf.mxu2 }
 0x2b3   :  { %669 = vmatpush.msra.mxu3 %v661_v53  ;;  %v613_v21 = vadd.f32 %v612_v54, %v526_v14 }
 0x2b5   :  { %670 = vmatpush.msra.mxu3 %v660_v55  ;;  %v652_v26 = vmax.f32 %v613_v21, 0.0 }
 0x2ba   :  { %v615_v56 = vpop.f32.mrf.mxu2 }
 0x2bb   :  { %v616_v18 = vadd.f32 %v615_v56, %v531_v11 }
 0x2bd   :  { %v653_v23 = vmax.f32 %v616_v18, 0.0 }
 0x2c2   :  { %v618_v57 = vpop.f32.mrf.mxu2 }
 0x2c3   :  { %v619_v15 = vadd.f32 %v618_v57, %v536_v5 }
 0x2c5   :  { %v654_v19 = vmax.f32 %v619_v15, 0.0 }
 0x2ca   :  { %v621_v58 = vpop.f32.mrf.mxu2 }
 0x2cb   :  { %v622_v12 = vadd.f32 %v621_v58, %v541_v2 }
 0x2cd   :  { %v655_v20 = vmax.f32 %v622_v12, 0.0 }
 0x2d2   :  { %v624_v59 = vpop.f32.mrf.mxu2 }
 0x2d3   :  { %v625_v9 = vadd.f32 %v624_v59, %v546_v1 }
 0x2d5   :  { %v656_v16 = vmax.f32 %v625_v9, 0.0 }
 0x2da   :  { %v627_v60 = vpop.f32.mrf.mxu2 }
 0x2db   :  { %v628_v7 = vadd.f32 %v627_v60, %v551_v63 }
 0x2dd   :  { %v657_v13 = vmax.f32 %v628_v7, 0.0 }
 0x2e2   :  { %v630_v0 = vpop.f32.mrf.mxu2 }
 0x2e3   :  { %v631_v3 = vadd.f32 %v630_v0, %v556_v62 }
 0x2e5   :  { %v658_v10 = vmax.f32 %v631_v3, 0.0 }
 0x2ea   :  { %v633_v4 = vpop.f32.mrf.mxu2 }
 0x2eb   :  { %v634_v6 = vadd.f32 %v633_v4, %v561_v61 }
 0x2ed   :  { %v659_v8 = vmax.f32 %v634_v6, 0.0 }
 0x2ef   :  { %671 = vmatpush.msra.mxu3 %v659_v8 }
 0x2f1   :  { %672 = vmatpush.msra.mxu3 %v658_v10 }
 0x2f3   :  { %673 = vmatpush.msra.mxu3 %v657_v13 }
 0x2f5   :  { %674 = vmatpush.msra.mxu3 %v656_v16 }
 0x2f7   :  { %675 = vmatpush.msra.mxu3 %v655_v20 }
 0x2f9   :  { %676 = vmatpush.msra.mxu3 %v654_v19 }
 0x2fb   :  { %677 = vmatpush.msra.mxu3 %v653_v23 }
 0x2fd   :  { %678 = vmatpush.msra.mxu3 %v652_v26 }
 0x2ff   :  { %679 = vmatpush.msra.mxu3 %v651_v29 }
 0x301   :  { %680 = vmatpush.msra.mxu3 %v650_v32 }
 0x303   :  { %681 = vmatpush.msra.mxu3 %v649_v33 }
 0x305   :  { %682 = vmatpush.msra.mxu3 %v648_v34 }
 0x306   :  { %683 = vmatmul.f32.vlgmr.msra.gmra.mxu3 %v664_v36 }
 0x389   :  { %v684_v35 = vpop.f32.mrf.mxu3 }
 0x38a   :  { %v685_v38 = vadd.f32 %v684_v35, %v666_v37 }
 0x38c   :  { %688 = vst.msk [vmem:[#allocation3] sm:$0x1] %vm687_vm1, %v685_v38 }
 0x38d   :  { %699 = dma.vmem_to_hbm [thread:$0]  %s695_s4, 16, %s697_s17, [#allocation4]  }
 0x38e   :  { %782 = dma.done.wait [#allocation4], 16  }
 0x38f   :  { %783 = vsyncadd [#allocation4], 4294967280 }
 0x390   :  { %704 = vsyncpa [#allocation4], 1 }

</bundles_post_ra>
